<compile_context>
chip_gen: v5e
topology: v5e:2x2
jax: 0.10.0
libtpu: 0.0.40
codegen_flags: <defaults>
</compile_context>

<pallas_src>
import jax
import jax.numpy as jnp
from jax.experimental import pallas as pl
from jax.experimental.pallas import tpu as pltpu

B, CIN, H, W = 2, 4, 16, 16
C = 8                 # merged-encoding channels (fixed by GroupNorm(8, 8))
KH = KW = 3
K2 = KH * KW * CIN    # 36 -- im2col contraction size
HW = H * W            # 256
EPS = 1e-5


def _sidetune_kernel(alpha_ref, patches_ref, wf_ref, bf_ref, wt_ref, bt_ref,
                     o_ref):
    # patches_ref : (K2, B*HW)  = (36, 512)   im2col of the spatially padded input
    # wf_ref      : (2C, K2)    = (16, 36)    [w_base ; w_side], weights-stationary
    # bf_ref      : (2C, 1)                   [b_base ; b_side]
    # wt_ref      : (C, C)                    transfer weights (out_ch, in_ch)
    # bt_ref      : (C, 1)                    transfer bias
    # alpha_ref   : (1,) in SMEM              merge_operators.Alpha raw param
    # o_ref       : (B, C, HW) = (2, 8, 256)  lane-dense NCHW-flattened output

    # Base + side conv (+bias, ReLU) as ONE fused MXU matmul, lane dim = B*HW.
    fused = jnp.dot(wf_ref[...], patches_ref[...],
                    preferred_element_type=jnp.float32) + bf_ref[...]
    fused = jnp.maximum(fused, 0.0)                              # (16, 512)

    # merge_operators.Alpha: sigmoid-gated convex combination.
    # Splat the SMEM scalar into a (1,1) vreg so sigmoid runs on the vector EUP.
    a = jax.nn.sigmoid(jnp.full((1, 1), alpha_ref[0], jnp.float32))
    merged = a * fused[:C, :] + (1.0 - a) * fused[C:, :]         # (8, 512)

    # Per-sample GroupNorm(8, 8, affine=False) + 1x1 transfer conv.
    # Stats are lane-axis reductions on (C, HW); static 128-aligned lane slices
    # pick out each batch element. (B=2, fully unrolled.)
    for b in range(B):
        m_b = merged[:, b * HW:(b + 1) * HW]                     # (8, 256)
        mean = jnp.mean(m_b, axis=1, keepdims=True)              # (8, 1)
        cen = m_b - mean
        var = jnp.mean(cen * cen, axis=1, keepdims=True)
        normed = cen * jax.lax.rsqrt(var + EPS)                  # (8, 256)
        out_b = jnp.dot(wt_ref[...], normed,
                        preferred_element_type=jnp.float32) + bt_ref[...]
        o_ref[b] = out_b                                         # lane-dense store


def lifelong_sidetune_forward(x_nchw, params):
    """x_nchw: (B, CIN, H, W) float32  ->  (B, C, H, W) float32."""
    x = x_nchw.astype(jnp.float32)
    x_pad = jnp.pad(x, ((0, 0), (0, 0), (1, 1), (1, 1)))         # (B, CIN, H+2, W+2)

    # im2col: patches[(kh*KW+kw)*CIN + cin, b*HW + h*W + w] = x_pad[b, cin, h+kh, w+kw]
    cols = []
    for kh in range(KH):
        for kw in range(KW):
            cols.append(x_pad[:, :, kh:kh + H, kw:kw + W].reshape(B, CIN, HW))
    patches = jnp.stack(cols, axis=1).reshape(B, K2, HW)          # (B, 36, 256)
    patches = jnp.transpose(patches, (1, 0, 2)).reshape(K2, B * HW)  # (36, 512)

    # Fuse base/side conv weights into one weights-stationary operand.
    wb = params['w_base'].reshape(K2, C).T                        # (C, 36)
    ws = params['w_side'].reshape(K2, C).T
    w_fused = jnp.concatenate([wb, ws], axis=0)                   # (2C, 36)
    b_fused = jnp.concatenate([params['b_base'].reshape(C, 1),
                               params['b_side'].reshape(C, 1)], axis=0)  # (2C, 1)
    w_tr = params['w_tr'].T                                       # (C_out, C_in)
    b_tr = params['b_tr'].reshape(C, 1)

    out = pl.pallas_call(
        _sidetune_kernel,
        out_shape=jax.ShapeDtypeStruct((B, C, HW), jnp.float32),
        in_specs=[
            pl.BlockSpec(memory_space=pltpu.MemorySpace.SMEM),    # alpha (1,)
            pl.BlockSpec(memory_space=pltpu.MemorySpace.VMEM),    # patches
            pl.BlockSpec(memory_space=pltpu.MemorySpace.VMEM),    # w_fused
            pl.BlockSpec(memory_space=pltpu.MemorySpace.VMEM),    # b_fused
            pl.BlockSpec(memory_space=pltpu.MemorySpace.VMEM),    # w_tr
            pl.BlockSpec(memory_space=pltpu.MemorySpace.VMEM),    # b_tr
        ],
        out_specs=pl.BlockSpec(memory_space=pltpu.MemorySpace.VMEM),
    )(params['alpha'], patches, w_fused, b_fused, w_tr, b_tr)

    # (B, C, HW) is already NCHW-flattened: a free reshape, no transpose needed.
    return out.reshape(B, C, H, W)


def _ref_forward(x_nchw, p):
    """Pure-JAX reference for correctness checking."""
    x = jnp.transpose(x_nchw, (0, 2, 3, 1)).astype(jnp.float32)

    def conv(xx, w, b):
        w = w.reshape(KH, KW, CIN, C)
        y = jax.lax.conv_general_dilated(
            xx, w, (1, 1), 'SAME',
            dimension_numbers=('NHWC', 'HWIO', 'NHWC'),
            precision=jax.lax.Precision.HIGHEST)
        return jnp.maximum(y + b.reshape(1, 1, 1, C), 0.0)

    base = conv(x, p['w_base'], p['b_base'])
    side = conv(x, p['w_side'], p['b_side'])
    a = jax.nn.sigmoid(p['alpha'][0])
    m = a * base + (1.0 - a) * side
    mean = jnp.mean(m, axis=(1, 2), keepdims=True)
    var = jnp.mean((m - mean) ** 2, axis=(1, 2), keepdims=True)
    n = (m - mean) / jnp.sqrt(var + EPS)
    out = jnp.einsum('bhwc,cd->bhwd', n, p['w_tr'],
                     precision=jax.lax.Precision.HIGHEST) + p['b_tr'].reshape(1, 1, 1, C)
    return jnp.transpose(out, (0, 3, 1, 2))


def _init_params(key):
    ks = jax.random.split(key, 6)
    return {
        'w_base': 0.1 * jax.random.normal(ks[0], (KH * KW, CIN, C), jnp.float32),
        'b_base': 0.1 * jax.random.normal(ks[1], (1, C), jnp.float32),
        'w_side': 0.1 * jax.random.normal(ks[2], (KH * KW, CIN, C), jnp.float32),
        'b_side': 0.1 * jax.random.normal(ks[3], (1, C), jnp.float32),
        'w_tr':   0.1 * jax.random.normal(ks[4], (C, C), jnp.float32),
        'b_tr':   0.1 * jax.random.normal(ks[5], (1, C), jnp.float32),
        # merge_operators.Alpha init: param = 0 => alpha = sigmoid(0) = 0.5
        'alpha':  jnp.zeros((1,), jnp.float32),
    }


# TODO(synk): pnn/dense multi-side-cache branches (pnn_full_cache plumbing,
# additional_encodings) have no static-shape Pallas equivalent here; only the
# default single-side Alpha-merge path is implemented.

if __name__ == "__main__":
    key = jax.random.PRNGKey(0)
    kx, kp = jax.random.split(key)
    x = jax.random.normal(kx, (B, CIN, H, W), jnp.float32)   # NCHW, like PyTorch
    params = _init_params(kp)

    out = jax.jit(lifelong_sidetune_forward)(x, params)
    out = jax.block_until_ready(out)

    ref = _ref_forward(x, params)
    assert out.shape == (B, C, H, W)
    assert jnp.allclose(out, ref, rtol=1e-3, atol=1e-3), "mismatch vs JAX reference"

    print("KERNEL_OK")
</pallas_src>

<mosaic_0001>
module attributes {stable_mosaic.version = 11 : i64} {
  func.func @_sidetune_kernel(%arg0: memref<1xf32, #tpu.memory_space<smem>>, %arg1: memref<36x512xf32, #tpu.memory_space<vmem>>, %arg2: memref<16x36xf32, #tpu.memory_space<vmem>>, %arg3: memref<16x1xf32, #tpu.memory_space<vmem>>, %arg4: memref<8x8xf32, #tpu.memory_space<vmem>>, %arg5: memref<8x1xf32, #tpu.memory_space<vmem>>, %arg6: memref<2x8x256xf32, #tpu.memory_space<vmem>>) attributes {dimension_semantics = [], scalar_prefetch = 0 : i64, scratch_operands = 0 : i64, tpu.core_type = #tpu.core_type<tc>} {
    %c0 = arith.constant 0 : index
    %c0_0 = arith.constant 0 : index
    %0 = vector.load %arg2[%c0, %c0_0] : memref<16x36xf32, #tpu.memory_space<vmem>>, vector<16x36xf32>
    %c0_1 = arith.constant 0 : index
    %c0_2 = arith.constant 0 : index
    %1 = vector.load %arg1[%c0_1, %c0_2] : memref<36x512xf32, #tpu.memory_space<vmem>>, vector<36x512xf32>
    %cst = arith.constant dense<0.000000e+00> : vector<16x512xf32>
    %2 = tpu.matmul %0, %1, %cst {dimension_numbers = #tpu.dot_dimension_numbers<[1], [0], [0], [1], [0, 0, 1, 1], [], []>} : vector<16x36xf32>, vector<36x512xf32>, vector<16x512xf32> -> vector<16x512xf32>
    %c0_3 = arith.constant 0 : index
    %c0_4 = arith.constant 0 : index
    %3 = vector.load %arg3[%c0_3, %c0_4] : memref<16x1xf32, #tpu.memory_space<vmem>>, vector<16x1xf32>
    %4 = vector.broadcast %3 : vector<16x1xf32> to vector<16x512xf32>
    %5 = arith.addf %2, %4 : vector<16x512xf32>
    %cst_5 = arith.constant 0.000000e+00 : f32
    %6 = vector.broadcast %cst_5 : f32 to vector<16x512xf32>
    %7 = arith.maximumf %5, %6 : vector<16x512xf32>
    %c0_6 = arith.constant 0 : index
    %8 = memref.load %arg0[%c0_6] : memref<1xf32, #tpu.memory_space<smem>>
    %9 = vector.broadcast %8 : f32 to vector<1x1xf32>
    %10 = arith.negf %9 : vector<1x1xf32>
    %11 = math.exp %10 : vector<1x1xf32>
    %cst_7 = arith.constant 1.000000e+00 : f32
    %12 = vector.broadcast %cst_7 : f32 to vector<1x1xf32>
    %13 = arith.addf %12, %11 : vector<1x1xf32>
    %14 = arith.divf %12, %13 : vector<1x1xf32>
    %15 = vector.extract_strided_slice %7 {offsets = [0, 0], sizes = [8, 512], strides = [1, 1]} : vector<16x512xf32> to vector<8x512xf32>
    %16 = vector.broadcast %14 : vector<1x1xf32> to vector<8x512xf32>
    %17 = arith.mulf %16, %15 : vector<8x512xf32>
    %cst_8 = arith.constant 1.000000e+00 : f32
    %18 = vector.broadcast %cst_8 : f32 to vector<1x1xf32>
    %19 = arith.subf %18, %14 : vector<1x1xf32>
    %20 = vector.extract_strided_slice %7 {offsets = [8, 0], sizes = [8, 512], strides = [1, 1]} : vector<16x512xf32> to vector<8x512xf32>
    %21 = vector.broadcast %19 : vector<1x1xf32> to vector<8x512xf32>
    %22 = arith.mulf %21, %20 : vector<8x512xf32>
    %23 = arith.addf %17, %22 : vector<8x512xf32>
    %24 = vector.extract_strided_slice %23 {offsets = [0, 0], sizes = [8, 256], strides = [1, 1]} : vector<8x512xf32> to vector<8x256xf32>
    %cst_9 = arith.constant dense<0.000000e+00> : vector<8xf32>
    %25 = vector.multi_reduction <add>, %24, %cst_9 [1] : vector<8x256xf32> to vector<8xf32>
    %26 = vector.shape_cast %25 : vector<8xf32> to vector<8x1xf32>
    %cst_10 = arith.constant 2.560000e+02 : f32
    %27 = vector.broadcast %cst_10 : f32 to vector<8x1xf32>
    %28 = arith.divf %26, %27 : vector<8x1xf32>
    %29 = vector.broadcast %28 : vector<8x1xf32> to vector<8x256xf32>
    %30 = arith.subf %24, %29 : vector<8x256xf32>
    %31 = arith.mulf %30, %30 : vector<8x256xf32>
    %cst_11 = arith.constant dense<0.000000e+00> : vector<8xf32>
    %32 = vector.multi_reduction <add>, %31, %cst_11 [1] : vector<8x256xf32> to vector<8xf32>
    %33 = vector.shape_cast %32 : vector<8xf32> to vector<8x1xf32>
    %cst_12 = arith.constant 2.560000e+02 : f32
    %34 = vector.broadcast %cst_12 : f32 to vector<8x1xf32>
    %35 = arith.divf %33, %34 : vector<8x1xf32>
    %cst_13 = arith.constant 9.99999974E-6 : f32
    %36 = vector.broadcast %cst_13 : f32 to vector<8x1xf32>
    %37 = arith.addf %35, %36 : vector<8x1xf32>
    %38 = math.rsqrt %37 : vector<8x1xf32>
    %39 = vector.broadcast %38 : vector<8x1xf32> to vector<8x256xf32>
    %40 = arith.mulf %30, %39 : vector<8x256xf32>
    %c0_14 = arith.constant 0 : index
    %c0_15 = arith.constant 0 : index
    %41 = vector.load %arg4[%c0_14, %c0_15] : memref<8x8xf32, #tpu.memory_space<vmem>>, vector<8x8xf32>
    %cst_16 = arith.constant dense<0.000000e+00> : vector<8x256xf32>
    %42 = tpu.matmul %41, %40, %cst_16 {dimension_numbers = #tpu.dot_dimension_numbers<[1], [0], [0], [1], [0, 0, 1, 1], [], []>} : vector<8x8xf32>, vector<8x256xf32>, vector<8x256xf32> -> vector<8x256xf32>
    %c0_17 = arith.constant 0 : index
    %c0_18 = arith.constant 0 : index
    %43 = vector.load %arg5[%c0_17, %c0_18] : memref<8x1xf32, #tpu.memory_space<vmem>>, vector<8x1xf32>
    %44 = vector.broadcast %43 : vector<8x1xf32> to vector<8x256xf32>
    %45 = arith.addf %42, %44 : vector<8x256xf32>
    %c0_19 = arith.constant 0 : index
    %c0_20 = arith.constant 0 : index
    %c0_21 = arith.constant 0 : index
    %46 = vector.load %arg6[%c0_19, %c0_20, %c0_21] : memref<2x8x256xf32, #tpu.memory_space<vmem>>, vector<1x8x256xf32>
    %47 = vector.shape_cast %46 : vector<1x8x256xf32> to vector<8x256xf32>
    %48 = vector.shape_cast %45 : vector<8x256xf32> to vector<1x8x256xf32>
    tpu.vector_store %arg6[%c0_19, %c0_20, %c0_21], %48 {strides = array<i32>} : memref<2x8x256xf32, #tpu.memory_space<vmem>>, vector<1x8x256xf32>,
    %49 = vector.extract_strided_slice %23 {offsets = [0, 256], sizes = [8, 256], strides = [1, 1]} : vector<8x512xf32> to vector<8x256xf32>
    %cst_22 = arith.constant dense<0.000000e+00> : vector<8xf32>
    %50 = vector.multi_reduction <add>, %49, %cst_22 [1] : vector<8x256xf32> to vector<8xf32>
    %51 = vector.shape_cast %50 : vector<8xf32> to vector<8x1xf32>
    %cst_23 = arith.constant 2.560000e+02 : f32
    %52 = vector.broadcast %cst_23 : f32 to vector<8x1xf32>
    %53 = arith.divf %51, %52 : vector<8x1xf32>
    %54 = vector.broadcast %53 : vector<8x1xf32> to vector<8x256xf32>
    %55 = arith.subf %49, %54 : vector<8x256xf32>
    %56 = arith.mulf %55, %55 : vector<8x256xf32>
    %cst_24 = arith.constant dense<0.000000e+00> : vector<8xf32>
    %57 = vector.multi_reduction <add>, %56, %cst_24 [1] : vector<8x256xf32> to vector<8xf32>
    %58 = vector.shape_cast %57 : vector<8xf32> to vector<8x1xf32>
    %cst_25 = arith.constant 2.560000e+02 : f32
    %59 = vector.broadcast %cst_25 : f32 to vector<8x1xf32>
    %60 = arith.divf %58, %59 : vector<8x1xf32>
    %cst_26 = arith.constant 9.99999974E-6 : f32
    %61 = vector.broadcast %cst_26 : f32 to vector<8x1xf32>
    %62 = arith.addf %60, %61 : vector<8x1xf32>
    %63 = math.rsqrt %62 : vector<8x1xf32>
    %64 = vector.broadcast %63 : vector<8x1xf32> to vector<8x256xf32>
    %65 = arith.mulf %55, %64 : vector<8x256xf32>
    %c0_27 = arith.constant 0 : index
    %c0_28 = arith.constant 0 : index
    %66 = vector.load %arg4[%c0_27, %c0_28] : memref<8x8xf32, #tpu.memory_space<vmem>>, vector<8x8xf32>
    %cst_29 = arith.constant dense<0.000000e+00> : vector<8x256xf32>
    %67 = tpu.matmul %66, %65, %cst_29 {dimension_numbers = #tpu.dot_dimension_numbers<[1], [0], [0], [1], [0, 0, 1, 1], [], []>} : vector<8x8xf32>, vector<8x256xf32>, vector<8x256xf32> -> vector<8x256xf32>
    %c0_30 = arith.constant 0 : index
    %c0_31 = arith.constant 0 : index
    %68 = vector.load %arg5[%c0_30, %c0_31] : memref<8x1xf32, #tpu.memory_space<vmem>>, vector<8x1xf32>
    %69 = vector.broadcast %68 : vector<8x1xf32> to vector<8x256xf32>
    %70 = arith.addf %67, %69 : vector<8x256xf32>
    %c1 = arith.constant 1 : index
    %c0_32 = arith.constant 0 : index
    %c0_33 = arith.constant 0 : index
    %71 = vector.load %arg6[%c1, %c0_32, %c0_33] : memref<2x8x256xf32, #tpu.memory_space<vmem>>, vector<1x8x256xf32>
    %72 = vector.shape_cast %71 : vector<1x8x256xf32> to vector<8x256xf32>
    %73 = vector.shape_cast %70 : vector<8x256xf32> to vector<1x8x256xf32>
    tpu.vector_store %arg6[%c1, %c0_32, %c0_33], %73 {strides = array<i32>} : memref<2x8x256xf32, #tpu.memory_space<vmem>>, vector<1x8x256xf32>,
    return
  }
}

</mosaic_0001>

<bundles_post_ra>
// kernel: lifelong_sidetune_forward.1
= control target key start
LH: loop header
LB: loop body
LE: loop exit
PB: predicated region body
PF: predicated region fallthrough
CT: control target
= control target key end

     0   :  { %vm65_vm0 = vcmask 1043456   ;;  %v412_v3 = vmov 0   ;;  %vm58_vm1 = vcmask 293888   ;;  %vm251_vm10 = vcmask 64512   ;;  %s558_s1 = inlined_call_operand.vmem [shape: f32[36,512], index: 1, kind: input, shape index: {}]   ;;  %s559_s2 = inlined_call_operand.vmem [shape: f32[16,36], index: 2, kind: input, shape index: {}]   ;;  %s560_s3 = inlined_call_operand.vmem [shape: f32[16,1], index: 3, kind: input, shape index: {}]   ;;  %s561_s5 = inlined_call_operand.vmem [shape: f32[8,1], index: 5, kind: input, shape index: {}]   ;;  %s562_s0 = inlined_call_operand.<no memory space> [shape: f32[1], index: 0, kind: input, shape index: {}]   ;;  %s563_s4 = inlined_call_operand.vmem [shape: f32[8,8], index: 4, kind: input, shape index: {}]   ;;  %s564_s6 = inlined_call_operand.vmem [shape: f32[2,8,256], index: 6, kind: output, shape index: {}]  }
   0x1   :  { %v42_v0 = vld [vmem:[%s558_s1 + $0x80] sm:$0xf]  ;;  %v43_v1 = vld [vmem:[%s558_s1 + $0x88] sm:$0xf]  ;;  %v44_v2 = vld [vmem:[%s558_s1 + $0x90] sm:$0xf]  ;;  %400 = vset.pattern.permute.xlu0 %v412_v3  ;;  %401 = vset.pattern.permute.xlu1 %v412_v3  ;;  %v179_v26 = vstv %s562_s0 }
   0x2   :  { %379 = vmatpush.msk.msra.mxu0 %vm65_vm0, %v42_v0  ;;  %382 = vmatpush.msk.msra.mxu1 %vm65_vm0, %v43_v1  ;;  %v45_v4 = vld [vmem:[%s558_s1 + $0x98] sm:$0xf]  ;;  %v38_v5 = vld [vmem:[%s558_s1 + $0x60] sm:$0xff]  ;;  %v39_v6 = vld [vmem:[%s558_s1 + $0x68] sm:$0xff]  ;;  %v391_v27 = vmul.f32 -1.442695, %v179_v26 }
   0x3   :  { %385 = vmatpush.msk.msra.mxu2 %vm65_vm0, %v44_v2  ;;  %388 = vmatpush.msk.msra.mxu3 %vm65_vm0, %v45_v4  ;;  %v40_v7 = vld [vmem:[%s558_s1 + $0x70] sm:$0xff]  ;;  %v41_v8 = vld [vmem:[%s558_s1 + $0x78] sm:$0xff]  ;;  %v34_v9 = vld [vmem:[%s558_s1 + $0x40] sm:$0xff] }
   0x4   :  { %90 = vmatpush.msra.mxu0 %v38_v5  ;;  %113 = vmatpush.msra.mxu1 %v39_v6  ;;  %v35_v10 = vld [vmem:[%s558_s1 + $0x48] sm:$0xff]  ;;  %v36_v11 = vld [vmem:[%s558_s1 + $0x50] sm:$0xff]  ;;  %v37_v12 = vld [vmem:[%s558_s1 + $0x58] sm:$0xff]  ;;  %402 = vpow2.f32 %v391_v27 }
   0x5   :  { %136 = vmatpush.msra.mxu2 %v40_v7  ;;  %159 = vmatpush.msra.mxu3 %v41_v8  ;;  %v30_v13 = vld [vmem:[%s558_s1 + $0x20] sm:$0xff]  ;;  %v31_v14 = vld [vmem:[%s558_s1 + $0x28] sm:$0xff]  ;;  %v32_v15 = vld [vmem:[%s558_s1 + $0x30] sm:$0xff] }
   0x6   :  { %91 = vmatpush.msra.mxu0 %v34_v9  ;;  %114 = vmatpush.msra.mxu1 %v35_v10  ;;  %v33_v16 = vld [vmem:[%s558_s1 + $0x38] sm:$0xff]  ;;  %v26_v17 = vld [vmem:[%s558_s1] sm:$0xff]  ;;  %v27_v18 = vld [vmem:[%s558_s1 + $0x8] sm:$0xff] }
   0x7   :  { %137 = vmatpush.msra.mxu2 %v36_v11  ;;  %160 = vmatpush.msra.mxu3 %v37_v12  ;;  %v28_v19 = vld [vmem:[%s558_s1 + $0x10] sm:$0xff]  ;;  %v29_v20 = vld [vmem:[%s558_s1 + $0x18] sm:$0xff]  ;;  %v24_v21 = vld [vmem:[%s559_s2] sm:$0xff] }
   0x8   :  { %92 = vmatpush.msra.mxu0 %v30_v13  ;;  %115 = vmatpush.msra.mxu1 %v31_v14  ;;  %v46_v22 = vld [vmem:[%s560_s3] sm:$0xff]  ;;  %v25_v23 = vld [vmem:[%s559_s2 + $0x8] sm:$0xff] }
   0x9   :  { %138 = vmatpush.msra.mxu2 %v32_v15  ;;  %161 = vmatpush.msra.mxu3 %v33_v16  ;;  %v47_v24 = vld [vmem:[%s560_s3 + $0x8] sm:$0xff]  ;;  %v532_v25 = vld [vmem:[%s561_s5] sm:$0xff] }
   0xa   :  { %93 = vmatpush.msra.mxu0 %v26_v17  ;;  %116 = vmatpush.msra.mxu1 %v27_v18  ;;  %v403_v28 = vpop.eup %402  ;;  %v413_v17 = vmov 256.0  }
   0xb   :  { %139 = vmatpush.msra.mxu2 %v28_v19  ;;  %162 = vmatpush.msra.mxu3 %v29_v20  ;;  %v183_v29 = vadd.f32 1.0, %v403_v28 }
   0xc   :  { %380 = vmatmul.msk.f32.vlgmr.msra.gmra.mxu0 %vm58_vm1, %v24_v21  ;;  %383 = vmatmul.msk.f32.vlgmr.msra.gmra.mxu1 %vm58_vm1, %v24_v21 }
   0xd   :  { %386 = vmatmul.msk.f32.vlgmr.msra.gmra.mxu2 %vm58_vm1, %v24_v21  ;;  %389 = vmatmul.msk.f32.vlgmr.msra.gmra.mxu3 %vm58_vm1, %v24_v21  ;;  %404 = vrcp.f32 %v183_v29  ;;  %vm189_vm2 = vweird.f32 %v183_v29  ;;  %v195_v37 = vand.u32 2147483648, %v183_v29  ;;  %v193_v40 = vand.u32 2147483647, %v183_v29 }
   0xe   :  { %50 = vperm.xlu0 %400, %v46_v22   ;;  %406 = vrcp.f32 %v413_v17 }
   0xf   :  { %v196_v42 = vor.u32 1.1754944e-38, %v195_v37  ;;  %vm194_vm5 = vcmp.eq.f32.partialorder %v193_v40, 8.507059e+37 }
  0x13   :  { %v405_v30 = vpop.eup %404 }
  0x14   :  { %381 = vmatmul.msk.f32.gmra.mxu0 %vm58_vm1, %v25_v23  ;;  %384 = vmatmul.msk.f32.gmra.mxu1 %vm58_vm1, %v25_v23  ;;  %v185_v31 = vmul.f32 %v405_v30, %v183_v29  ;;  %vm190_vm3 = vweird.f32 %v405_v30  ;;  %v407_v18 = vpop.eup %406 }
  0x15   :  { %387 = vmatmul.msk.f32.gmra.mxu2 %vm58_vm1, %v25_v23  ;;  %390 = vmatmul.msk.f32.gmra.mxu3 %vm58_vm1, %v25_v23  ;;  %vm191_vm4 = vmor %vm189_vm2, %vm190_vm3  ;;  %v216_v19 = vmul.f32 256.0, %v407_v18  ;;  %vm220_vm6 = vweird.f32 %v407_v18 }
  0x16   :  { %55 = vperm.xlu0 %400, %v47_v24   ;;  %v186_v32 = vsub.f32 1.0, %v185_v31 }
  0x17   :  { %v217_v20 = vsub.f32 1.0, %v216_v19 }
  0x18   :  { %v187_v34 = vmul.f32 %v405_v30, %v186_v32 }
  0x19   :  { %v218_v21 = vmul.f32 %v407_v18, %v217_v20 }
  0x1a   :  { %v188_v39 = vadd.f32 %v405_v30, %v187_v34 }
  0x1b   :  { %v219_v22 = vadd.f32 %v407_v18, %v218_v21 }
  0x1c   :  { %v192_v43 = vsel %vm191_vm4, %v405_v30, %v188_v39 }
  0x1d   :  { %v197_v49 = vsel %vm194_vm5, %v196_v42, %v192_v43  ;;  %v221_v23 = vsel %vm220_vm6, %v407_v18, %v219_v22 }
  0x1e   :  { %248 = vperm.xlu0 %400, %v532_v25   ;;  %v203_v58 = vsub.f32 1.0, %v197_v49 }
  0x80   :  { %v51_v36 = vpop.permute.xlu0 %50 }
  0x88   :  { %v56_v48 = vpop.permute.xlu0 %55 }
  0x89   :  { %v95_v33 = vpop.f32.mrf.mxu0  ;;  %v118_v35 = vpop.f32.mrf.mxu1 }
  0x8a   :  { %v96_v60 = vadd.f32 %v95_v33, %v51_v36  ;;  %v119_v61 = vadd.f32 %v118_v35, %v51_v36 }
  0x8c   :  { %v170_v6 = vmax.f32 %v96_v60, 0.0  ;;  %v171_v7 = vmax.f32 %v119_v61, 0.0 }
  0x8e   :  { %v199_v12 = vmul.f32 %v197_v49, %v170_v6  ;;  %v200_v13 = vmul.f32 %v197_v49, %v171_v7 }
  0x90   :  { %v141_v38 = vpop.f32.mrf.mxu2  ;;  %v164_v41 = vpop.f32.mrf.mxu3 }
  0x91   :  { %v142_v44 = vadd.f32 %v141_v38, %v51_v36  ;;  %v165_v45 = vadd.f32 %v164_v41, %v51_v36  ;;  %v98_v46 = vpop.f32.mrf.mxu0  ;;  %v121_v47 = vpop.f32.mrf.mxu1 }
  0x92   :  { %v99_v55 = vadd.f32 %v98_v46, %v56_v48  ;;  %v122_v56 = vadd.f32 %v121_v47, %v56_v48 }
  0x93   :  { %v172_v51 = vmax.f32 %v142_v44, 0.0  ;;  %v173_v54 = vmax.f32 %v165_v45, 0.0 }
  0x94   :  { %v174_v2 = vmax.f32 %v99_v55, 0.0  ;;  %v175_v3 = vmax.f32 %v122_v56, 0.0  ;;  %v244_v56 = vld [vmem:[%s563_s4] sm:$0xff] }
  0x95   :  { %v201_v63 = vmul.f32 %v197_v49, %v172_v51  ;;  %v202_v1 = vmul.f32 %v197_v49, %v173_v54 }
  0x96   :  { %v204_v9 = vmul.f32 %v203_v58, %v174_v2  ;;  %v205_v10 = vmul.f32 %v203_v58, %v175_v3  ;;  %v249_v2 = vpop.permute.xlu0 %248 }
  0x98   :  { %v144_v50 = vpop.f32.mrf.mxu2  ;;  %v167_v53 = vpop.f32.mrf.mxu3  ;;  %v208_v14 = vadd.f32 %v204_v9, %v199_v12  ;;  %v209_v15 = vadd.f32 %v205_v10, %v200_v13 }
  0x99   :  { %v145_v52 = vadd.f32 %v144_v50, %v56_v48  ;;  %v168_v57 = vadd.f32 %v167_v53, %v56_v48 }
  0x9a   :  { %v212_v16 = vadd.f32 %v209_v15, %v208_v14 }
  0x9b   :  { %v176_v59 = vmax.f32 %v145_v52, 0.0  ;;  %v177_v62 = vmax.f32 %v168_v57, 0.0 }
  0x9d   :  { %v206_v0 = vmul.f32 %v203_v58, %v176_v59  ;;  %v207_v4 = vmul.f32 %v203_v58, %v177_v62 }
  0x9f   :  { %v210_v5 = vadd.f32 %v206_v0, %v201_v63  ;;  %v211_v8 = vadd.f32 %v207_v4, %v202_v1 }
  0xa1   :  { %v297_v11 = vadd.f32 %v211_v8, %v210_v5 }
  0xa3   :  { %298 = vadd.xlane.f32.xlu1 %v297_v11 }
  0xab   :  { %213 = vadd.xlane.f32.xlu1 %v212_v16 }
  0xc4   :  { %326 = vperm.xlu1 %401, %v532_v25  }
 0x116   :  { %v299_v24 = vpop.xlane.xlu1 %298 }
 0x117   :  { %v300_v26 = vmul.f32 %v299_v24, %v221_v23 }
 0x119   :  { %v301_v27 = vsub.f32 %v210_v5, %v300_v26  ;;  %v302_v28 = vsub.f32 %v211_v8, %v300_v26 }
 0x11b   :  { %v303_v29 = vmul.f32 %v301_v27, %v301_v27  ;;  %v304_v30 = vmul.f32 %v302_v28, %v302_v28 }
 0x11d   :  { %v305_v31 = vadd.f32 %v304_v30, %v303_v29 }
 0x11e   :  { %v214_v32 = vpop.xlane.xlu1 %213 }
 0x11f   :  { %v222_v33 = vmul.f32 %v221_v23, %v214_v32  ;;  %306 = vadd.xlane.f32.xlu2 %v305_v31 }
 0x121   :  { %v223_v25 = vsub.f32 %v208_v14, %v222_v33  ;;  %v224_v34 = vsub.f32 %v209_v15, %v222_v33 }
 0x123   :  { %v225_v35 = vmul.f32 %v223_v25, %v223_v25  ;;  %v226_v36 = vmul.f32 %v224_v34, %v224_v34 }
 0x125   :  { %v227_v37 = vadd.f32 %v226_v36, %v225_v35 }
 0x127   :  { %228 = vadd.xlane.f32.xlu2 %v227_v37 }
 0x136   :  { %v327_v63 = vpop.permute.xlu1 %326 }
 0x192   :  { %v307_v38 = vpop.xlane.xlu2 %306 }
 0x193   :  { %v308_v39 = vmul.f32 %v307_v38, %v221_v23 }
 0x195   :  { %v309_v40 = vadd.f32 1e-05, %v308_v39 }
 0x197   :  { %408 = vrsqrt.f32 %v309_v40  ;;  %vm316_vm8 = vweird.f32 %v309_v40 }
 0x19a   :  { %v229_v41 = vpop.xlane.xlu2 %228 }
 0x19b   :  { %v230_v42 = vmul.f32 %v229_v41, %v221_v23 }
 0x19d   :  { %v409_v43 = vpop.eup %408  ;;  %v231_v44 = vadd.f32 1e-05, %v230_v42 }
 0x19e   :  { %v311_v45 = vmul.f32 %v409_v43, %v309_v40  ;;  %vm317_vm7 = vweird.f32 %v409_v43 }
 0x19f   :  { %410 = vrsqrt.f32 %v231_v44  ;;  %vm318_vm9 = vmor %vm316_vm8, %vm317_vm7  ;;  %vm238_vm12 = vweird.f32 %v231_v44 }
 0x1a0   :  { %v312_v46 = vmul.f32 %v409_v43, %v311_v45 }
 0x1a2   :  { %v313_v47 = vmul.f32 0.5, %v312_v46 }
 0x1a4   :  { %v314_v48 = vsub.f32 1.5, %v313_v47 }
 0x1a5   :  { %v411_v49 = vpop.eup %410 }
 0x1a6   :  { %v233_v50 = vmul.f32 %v411_v49, %v231_v44  ;;  %v315_v51 = vmul.f32 %v409_v43, %v314_v48  ;;  %vm239_vm11 = vweird.f32 %v411_v49 }
 0x1a7   :  { %vm240_vm13 = vmor %vm238_vm12, %vm239_vm11 }
 0x1a8   :  { %v234_v52 = vmul.f32 %v411_v49, %v233_v50  ;;  %v319_v53 = vsel %vm318_vm9, %v409_v43, %v315_v51 }
 0x1a9   :  { %v320_v54 = vmul.f32 %v319_v53, %v301_v27  ;;  %v321_v55 = vmul.f32 %v319_v53, %v302_v28 }
 0x1aa   :  { %v235_v57 = vmul.f32 0.5, %v234_v52 }
 0x1ab   :  { %347 = vmatpush.msrb.mxu2 %v320_v54  ;;  %367 = vmatpush.msrb.mxu3 %v321_v55 }
 0x1ac   :  { %v236_v58 = vsub.f32 1.5, %v235_v57  ;;  %394 = vmatmul.msk.f32.vlgmr.msrb.gmra.mxu2 %vm251_vm10, %v244_v56  ;;  %395 = vmatmul.msk.f32.vlgmr.msrb.gmra.mxu3 %vm251_vm10, %v244_v56 }
 0x1ae   :  { %v237_v59 = vmul.f32 %v411_v49, %v236_v58 }
 0x1b0   :  { %v241_v60 = vsel %vm240_vm13, %v411_v49, %v237_v59 }
 0x1b1   :  { %v242_v61 = vmul.f32 %v241_v60, %v223_v25  ;;  %v243_v62 = vmul.f32 %v241_v60, %v224_v34 }
 0x1b3   :  { %270 = vmatpush.msrb.mxu0 %v242_v61  ;;  %290 = vmatpush.msrb.mxu1 %v243_v62 }
 0x1b4   :  { %392 = vmatmul.msk.f32.vlgmr.msrb.gmra.mxu0 %vm251_vm10, %v244_v56  ;;  %393 = vmatmul.msk.f32.vlgmr.msrb.gmra.mxu1 %vm251_vm10, %v244_v56 }
 0x22f   :  { %v349_v0 = vpop.f32.mrf.mxu2  ;;  %v369_v1 = vpop.f32.mrf.mxu3 }
 0x230   :  { %v350_v3 = vadd.f32 %v349_v0, %v327_v63  ;;  %v370_v4 = vadd.f32 %v369_v1, %v327_v63 }
 0x231   :  { %v272_v5 = vpop.f32.mrf.mxu0  ;;  %v292_v6 = vpop.f32.mrf.mxu1 }
 0x232   :  { %v273_v7 = vadd.f32 %v272_v5, %v249_v2  ;;  %v293_v8 = vadd.f32 %v292_v6, %v249_v2  ;;  %396 = vst [vmem:[%s564_s6 + $0x10] sm:$0xff] %v350_v3 }
 0x233   :  { %397 = vst [vmem:[%s564_s6 + $0x18] sm:$0xff] %v370_v4 }
 0x234   :  { %295 = vst [vmem:[%s564_s6] sm:$0xff] %v273_v7 }
 0x235   :  { %296 = vst [vmem:[%s564_s6 + $0x8] sm:$0xff] %v293_v8 }

</bundles_post_ra>
